<compile_context>
chip_gen: v6e
topology: v6e:2x2x1
jax: 0.10.0
libtpu: 0.0.40
codegen_flags: <defaults>
</compile_context>

<pallas_src>
import math

import jax
import jax.numpy as jnp
from jax.experimental import pallas as pl
from jax.experimental.pallas import tpu as pltpu


_MAX_LANE_WIDTH = 16384   # cap for the lane-dense repack width

# Per-generation tiling / VMEM budgets.
_CHIP_CONFIGS = {
    #           block budget    scoped default   max request        TensorCores
    "v7x":     dict(block=8 << 20, scoped=32 << 20, cap=48 << 20, cores=2),
    "v6e":     dict(block=4 << 20, scoped=32 << 20, cap=96 << 20, cores=1),
    "v5e":     dict(block=2 << 20, scoped=16 << 20, cap=96 << 20, cores=1),
    "unknown": dict(block=2 << 20, scoped=16 << 20, cap=48 << 20, cores=1),
}


def _chip_generation():
    try:
        kind = jax.devices()[0].device_kind.lower()
    except Exception:
        return "unknown"
    if "v7" in kind:
        return "v7x"
    if "v6" in kind:
        return "v6e"
    if "v5" in kind:
        return "v5e"   # treat v5p conservatively like v5e
    return "unknown"


def _bias_add_kernel(x_ref, b_ref, o_ref):
    # x_ref: (tm, C), b_ref: (1, C) -> broadcast add over rows (sublanes).
    o_ref[...] = x_ref[...] + b_ref[...]


def _round_up(x, m):
    return ((x + m - 1) // m) * m


def _sublane_min(dtype):
    # Sub-32-bit dtypes pack along sublanes: one vreg holds 8/16/32 rows.
    itemsize = jnp.dtype(dtype).itemsize
    if itemsize >= 4:
        return 8
    if itemsize == 2:
        return 16
    return 32


def _choose_row_tile(M, Ctot, dtype, cfg):
    """Row tile tm; the lane tile is always the full width Ctot (contiguous)."""
    itemsize = jnp.dtype(dtype).itemsize
    smin = _sublane_min(dtype)

    if M <= smin:
        return M                        # block dims equal full array dims: legal

    tm = cfg["block"] // (Ctot * itemsize)
    tm = max(smin, (tm // smin) * smin)
    if tm >= M:
        tm = M                          # one full block (block dim == array dim)

    if cfg["cores"] >= 2:
        steps = pl.cdiv(M, tm)
        if steps < 2:
            # Two TensorCores: give the row grid at least 2 steps.
            tm = max(smin, _round_up(pl.cdiv(M, 2), smin))
        elif steps % 2 == 1 and steps >= 3:
            # Prefer an even step count so neither core idles on the tail.
            tm2 = max(smin, _round_up(pl.cdiv(M, steps + 1), smin))
            if pl.cdiv(M, tm2) % 2 == 0:
                tm = tm2
    return tm


def _vmem_limit_bytes(tm, Ctot, dtype, cfg, gen):
    itemsize = jnp.dtype(dtype).itemsize
    block = tm * Ctot * itemsize
    # 2x double-buffered input + 2x output + bias tiles + headroom.
    needed = 4 * block + 2 * Ctot * itemsize + (2 << 20)
    if gen == "v7x":
        # Explicitly raise the scoped limit on v7x (large blocks), but stay
        # well under the 64 MiB physical VMEM.
        return min(max(40 << 20, needed), cfg["cap"])
    if needed > cfg["scoped"]:
        return min(needed, cfg["cap"])
    return None


def _bias_add_2d(x2, b2, tm, cfg, gen, donate):
    """x2: (M, Ctot), b2: (1, Ctot); blocked (tm, Ctot) broadcast add."""
    M, Ctot = x2.shape
    itemsize = jnp.dtype(x2.dtype).itemsize
    cost = pl.CostEstimate(
        flops=M * Ctot,
        transcendentals=0,
        bytes_accessed=2 * M * Ctot * itemsize + Ctot * itemsize,
    )
    return pl.pallas_call(
        _bias_add_kernel,
        out_shape=jax.ShapeDtypeStruct((M, Ctot), x2.dtype),
        grid_spec=pltpu.PrefetchScalarGridSpec(
            num_scalar_prefetch=0,
            grid=(pl.cdiv(M, tm),),
            in_specs=[
                pl.BlockSpec((tm, Ctot), lambda i: (i, 0)),
                pl.BlockSpec((1, Ctot), lambda i: (0, 0)),   # bias stays resident
            ],
            out_specs=pl.BlockSpec((tm, Ctot), lambda i: (i, 0)),
        ),
        compiler_params=pltpu.CompilerParams(
            dimension_semantics=("parallel",),
            vmem_limit_bytes=_vmem_limit_bytes(tm, Ctot, x2.dtype, cfg, gen),
        ),
        cost_estimate=cost,
        input_output_aliases=({0: 0} if donate else {}),
    )(x2, b2)


def _lane_dense_width(C, total):
    """Lane-dense repack width L, or None if it would require any padding."""
    if C % 128 == 0:
        return None                     # already lane-aligned; no repack needed
    L = (C * 128) // math.gcd(C, 128)   # lcm(C, 128)
    if L > _MAX_LANE_WIDTH or total % L != 0:
        return None                     # padding would cost extra HBM passes
    # Widen toward 1024-4096 lanes while the no-padding guarantee holds.
    for target in (4096, 2048, 1024, 512):
        k = target // L
        if k >= 2 and total % (L * k) == 0:
            return L * k
    return L


def learnable_bias_forward(x, bias, *, donate_x=False):
    """out = x + bias broadcast over the last axis of x (expand_as semantics).

    donate_x=True aliases x's HBM buffer as the output; only meaningful when x
    is dead after this call and the wrapper-side reshape is copy-free.
    """
    C = x.shape[-1]
    assert bias.shape == (C,), "bias must match the last dim of x (expand_as)"
    orig_shape = x.shape
    total = math.prod(orig_shape)

    # Match PyTorch type promotion (e.g. bf16 x + fp32 bias -> fp32 out).
    out_dtype = jnp.result_type(x.dtype, bias.dtype)
    if out_dtype != x.dtype:
        x = x.astype(out_dtype)
        donate_x = False                # would alias a temporary, not the caller's x
    b = bias.astype(out_dtype)

    gen = _chip_generation()
    cfg = _CHIP_CONFIGS[gen]

    L = _lane_dense_width(C, total)
    if L is not None:
        # Repack to a lane-dense width (multiple of C and of 128) with the bias
        # tiled across it -> unmasked full-lane stores, zero pad/slice copies.
        x2 = x.reshape(-1, L)
        b2 = jnp.tile(b, L // C).reshape(1, L)
        tm = _choose_row_tile(x2.shape[0], L, out_dtype, cfg)
        out = _bias_add_2d(x2, b2, tm, cfg, gen, donate_x)
        return out.reshape(orig_shape)

    # Plain layout: the block's last dim equals the full row width (always
    # legal).  Stores are masked only when C % 128 != 0, which is still far
    # cheaper than the extra HBM read+write a pad-based repack would cost.
    x2 = x.reshape(-1, C)
    b2 = b.reshape(1, C)
    tm = _choose_row_tile(x2.shape[0], C, out_dtype, cfg)
    out = _bias_add_2d(x2, b2, tm, cfg, gen, donate_x)
    return out.reshape(orig_shape)


if __name__ == "__main__":
    key = jax.random.PRNGKey(0)
    kx, kb = jax.random.split(key)

    # Small out_chn = 16 -> exercises the pad-free lane-dense repack path.
    B, H, W, C = 2, 4, 16, 16
    x = jax.random.normal(kx, (B, H, W, C), dtype=jnp.float32)
    # nn.Parameter(torch.zeros(out_chn)) plus a small deterministic
    # perturbation so the add is non-trivial to verify.
    bias = jnp.zeros((C,), jnp.float32) + 0.01 * jnp.arange(C, dtype=jnp.float32)
    ref = x + bias
    out = jax.block_until_ready(learnable_bias_forward(x, bias))
    assert out.shape == x.shape and out.dtype == x.dtype
    assert jnp.allclose(out, ref, atol=1e-6), "mismatch vs reference (C=16)"

    # 128-aligned channels with a row count that does not divide the row tile
    # -> direct path, cdiv grid, (possibly) partial last block.
    C2 = 256
    x2 = jax.random.normal(kb, (3, 5, C2), dtype=jnp.float32)
    bias2 = 0.05 * jnp.arange(C2, dtype=jnp.float32) - 1.0
    ref2 = x2 + bias2
    out2 = jax.block_until_ready(learnable_bias_forward(x2, bias2))
    assert out2.shape == x2.shape
    assert jnp.allclose(out2, ref2, atol=1e-6), "mismatch vs reference (C=256)"

    # Non-128-aligned channels where the repack would need padding -> fallback
    # plain path with masked stores (no jnp.pad / slice copies anywhere).
    C3 = 48
    x3 = jax.random.normal(kx, (3, 7, C3), dtype=jnp.float32)
    bias3 = 0.02 * jnp.arange(C3, dtype=jnp.float32)
    ref3 = x3 + bias3
    out3 = jax.block_until_ready(learnable_bias_forward(x3, bias3))
    assert out3.shape == x3.shape
    assert jnp.allclose(out3, ref3, atol=1e-6), "mismatch vs reference (C=48)"

    print("KERNEL_OK")
</pallas_src>

<mosaic_0001>
module attributes {stable_mosaic.version = 11 : i64} {
  func.func @_bias_add_kernel(%arg0: i32, %arg1: memref<1x2048xf32, #tpu.memory_space<vmem>>, %arg2: memref<1x2048xf32, #tpu.memory_space<vmem>>, %arg3: memref<1x2048xf32, #tpu.memory_space<vmem>>) attributes {dimension_semantics = [#tpu.dimension_semantics<parallel>], iteration_bounds = array<i64: 1>, scalar_prefetch = 0 : i64, scratch_operands = 0 : i64, tpu.core_type = #tpu.core_type<tc>, window_params = [{transform_indices = @transform_0, window_bounds = array<i64: 1, 2048>}, {pipeline_mode = #tpu.pipeline_mode<synchronous>, transform_indices = @transform_1, window_bounds = array<i64: 1, 2048>}, {transform_indices = @transform_2, window_bounds = array<i64: 1, 2048>}]} {
    %c0 = arith.constant 0 : index
    %c0_0 = arith.constant 0 : index
    %0 = vector.load %arg1[%c0, %c0_0] : memref<1x2048xf32, #tpu.memory_space<vmem>>, vector<1x2048xf32>
    %c0_1 = arith.constant 0 : index
    %c0_2 = arith.constant 0 : index
    %1 = vector.load %arg2[%c0_1, %c0_2] : memref<1x2048xf32, #tpu.memory_space<vmem>>, vector<1x2048xf32>
    %2 = arith.addf %0, %1 : vector<1x2048xf32>
    %c0_3 = arith.constant 0 : index
    %c0_4 = arith.constant 0 : index
    %3 = vector.load %arg3[%c0_3, %c0_4] : memref<1x2048xf32, #tpu.memory_space<vmem>>, vector<1x2048xf32>
    tpu.vector_store %arg3[%c0_3, %c0_4], %2 {strides = array<i32>} : memref<1x2048xf32, #tpu.memory_space<vmem>>, vector<1x2048xf32>,
    return
  }
  func.func @transform_0(%arg0: i32) -> (i32, i32) {
    %c0_i32 = arith.constant 0 : i32
    %c0_i32_0 = arith.constant 0 : i32
    return %arg0, %c0_i32 : i32, i32
  }
  func.func @transform_1(%arg0: i32) -> (i32, i32) {
    %c0_i32 = arith.constant 0 : i32
    %c0_i32_0 = arith.constant 0 : i32
    %c0_i32_1 = arith.constant 0 : i32
    return %c0_i32, %c0_i32_0 : i32, i32
  }
  func.func @transform_2(%arg0: i32) -> (i32, i32) {
    %c0_i32 = arith.constant 0 : i32
    %c0_i32_0 = arith.constant 0 : i32
    return %arg0, %c0_i32 : i32, i32
  }
}

</mosaic_0001>

<bundles_post_ra>
// kernel: tpu_custom_call.1
= control target key start
LH: loop header
LB: loop body
LE: loop exit
PB: predicated region body
PF: predicated region fallthrough
CT: control target
= control target key end

     0   :  { %7 = vsyncpa [#allocation3], 0  ;;  %s156_s0 = inlined_call_operand.hbm [shape: f32[1,2048], index: 0, kind: input, shape index: {}]   ;;  %s157_s1 = inlined_call_operand.hbm [shape: f32[1,2048], index: 1, kind: input, shape index: {}]   ;;  %s158_s2 = inlined_call_operand.hbm [shape: f32[1,2048], index: 2, kind: output, shape index: {}]  }
   0x1   :  { %8 = vsyncpa [#allocation6], 0 }
   0x2   :  { %9 = vsyncpa [#allocation4], 0  ;;  %s129_s9 = smov [#allocation2]   ;;  %s130_s11 = smov [#allocation5]  }
   0x3   :  { %s16_s10 = sshll.u32 %s129_s9, 4  ;;  %s26_s12 = sshll.u32 %s130_s11, 4  ;;  %s17_s10 = int_to_ptr.vmem [resolvable:$true] %s16_s10  ;;  %s27_s12 = int_to_ptr.vmem [resolvable:$true] %s26_s12 }
   0x4   :  { %s71_s13 = scalar_lea.vmem %s17_s10, 256  ;;  %p76_p1 = scmp.lt.s32.totalorder %s17_s10, %s17_s10 }
   0x5   :  { %p72_p0 = scmp.ne.s32.totalorder %s17_s10, %s71_s13  ;;  %p77_p2 = scmp.lt.s32.totalorder %s71_s13, %s71_s13 }
   0x7   :  { %p78_p3 = por %p77_p2, %p76_p1 }
   0x9   :  { %p79_p4 = pnand %p78_p3, %p72_p0 }
   0xb   :  { %82 = shalt.err (!%p79_p4)
}
   0xc   :  { %19 = dma.hbm_to_vmem [thread:$0]  %s156_s0, 256, %s17_s10, [#allocation3]  }
   0xd   :  { %s91_s16 = scalar_lea.vmem %s27_s12, 256  ;;  %p96_p6 = scmp.lt.s32.totalorder %s27_s12, %s27_s12 }
   0xe   :  { %p92_p5 = scmp.ne.s32.totalorder %s27_s12, %s91_s16  ;;  %p97_p7 = scmp.lt.s32.totalorder %s91_s16, %s91_s16 }
  0x10   :  { %p98_p8 = por %p97_p7, %p96_p6 }
  0x12   :  { %p99_p9 = pnand %p98_p8, %p92_p5 }
  0x14   :  { %102 = shalt.err (!%p99_p9)
}
  0x15   :  { %29 = dma.hbm_to_vmem [thread:$0]  %s157_s1, 256, %s27_s12, [#allocation6]  }
  0x16   :  { %123 = dma.done.wait [#allocation3], 256  }
  0x17   :  { %124 = vsyncadd [#allocation3], 4294967040 }
  0x18   :  { %125 = dma.done.wait [#allocation6], 256  }
  0x19   :  { %126 = vsyncadd [#allocation6], 4294967040  ;;  %s131_s19 = smov [#allocation7]   ;;  %v36_v0 = vld [vmem:[#allocation2] sm:$0xff]  ;;  %v38_v1 = vld [vmem:[#allocation5] sm:$0xff] }
  0x1a   :  { %s50_s20 = sshll.u32 %s131_s19, 4  ;;  %v37_v2 = vld [vmem:[#allocation2 + $0x8] sm:$0xff]  ;;  %v40_v3 = vadd.f32 %v38_v1, %v36_v0  ;;  %v39_v4 = vld [vmem:[#allocation5 + $0x8] sm:$0xff]  ;;  %s51_s20 = int_to_ptr.vmem [resolvable:$true] %s50_s20 }
  0x1b   :  { %v41_v5 = vadd.f32 %v39_v4, %v37_v2  ;;  %s103_s0 = scalar_lea.vmem %s51_s20, 256  ;;  %p108_p11 = scmp.lt.s32.totalorder %s51_s20, %s51_s20 }
  0x1c   :  { %42 = vst [vmem:[#allocation7] sm:$0xff] %v40_v3  ;;  %p104_p10 = scmp.ne.s32.totalorder %s51_s20, %s103_s0  ;;  %p109_p12 = scmp.lt.s32.totalorder %s103_s0, %s103_s0 }
  0x1d   :  { %43 = vst [vmem:[#allocation7 + $0x8] sm:$0xff] %v41_v5 }
  0x1e   :  { %p110_p13 = por %p109_p12, %p108_p11 }
  0x20   :  { %p111_p0 = pnand %p110_p13, %p104_p10 }
  0x22   :  { %114 = shalt.err (!%p111_p0)
}
  0x23   :  { %53 = dma.vmem_to_hbm [thread:$0]  %s51_s20, 256, %s158_s2, [#allocation4]  }
  0x24   :  { %127 = dma.done.wait [#allocation4], 256  }
  0x25   :  { %128 = vsyncadd [#allocation4], 4294967040 }
  0x26   :  { %57 = vsyncpa [#allocation3], 1 }
  0x27   :  { %58 = vsyncpa [#allocation6], 1 }
  0x28   :  { %59 = vsyncpa [#allocation4], 1 }

</bundles_post_ra>
